<compile_context>
chip_gen: v7x
topology: tpu7x:2x2x1
jax: 0.10.0
libtpu: 0.0.40
codegen_flags: <defaults>
</compile_context>

<pallas_src>
import functools

import jax
import jax.numpy as jnp
from jax.experimental import pallas as pl
from jax.experimental.pallas import tpu as pltpu


def _scale_hardsigmoid_kernel(x_ref, o_ref, *, k):
    x = x_ref[...]
    # hardsigmoid(x * scale) = clamp(x * (scale/6) + 0.5, 0, 1)
    out = jnp.clip(
        x * jnp.asarray(k, x.dtype) + jnp.asarray(0.5, x.dtype),
        jnp.asarray(0.0, x.dtype),
        jnp.asarray(1.0, x.dtype),
    )
    o_ref[...] = out.astype(o_ref.dtype)


def scale_hardsigmoid(x, scale=3, *, target_tile_bytes=2 * 1024 * 1024):
    """Applies hardsigmoid(x * scale) elementwise via a Pallas TPU kernel.

    Any shape / float dtype. Flattened to a lane-dense (rows, W) slab where W is
    a wide multiple of 128; processed in ~2 MiB row-tiles; reshaped back.
    Padding / slicing is skipped entirely when sizes already line up.
    """
    orig_shape = x.shape
    orig_dtype = x.dtype
    n = int(x.size)
    itemsize = jnp.dtype(orig_dtype).itemsize
    k = float(scale) / 6.0

    # --- choose a wide, lane-dense slab width (multiple of 128) -----------------
    W = 128
    for w in (2048, 1024, 512, 256, 128):
        if n % w == 0:
            W = w
            break
    rows = pl.cdiv(n, W)  # == n // W when W divides n

    # --- choose tile_rows so one block is ~target_tile_bytes --------------------
    desired = max(8, (target_tile_bytes // (W * itemsize)) // 8 * 8)
    if rows <= desired:
        # single block along rows: block dim == full array dim (always legal)
        tile_rows = rows
    else:
        tile_rows = desired
        # prefer an exact divisor near `desired` (>= desired/2) to avoid padding
        lo = max(8, (desired // 2) // 8 * 8)
        for tr in range(desired, lo - 1, -8):
            if rows % tr == 0:
                tile_rows = tr
                break

    rows_pad = pl.cdiv(rows, tile_rows) * tile_rows
    total_pad = rows_pad * W

    # --- flatten; pad only if genuinely required (fast path: pure reshape) ------
    x_flat = x.reshape(-1)
    if total_pad != n:
        x_flat = jnp.pad(x_flat, (0, total_pad - n))
    x2d = x_flat.reshape(rows_pad, W)

    grid = (rows_pad // tile_rows,)

    out2d = pl.pallas_call(
        functools.partial(_scale_hardsigmoid_kernel, k=k),
        out_shape=jax.ShapeDtypeStruct((rows_pad, W), orig_dtype),
        grid_spec=pltpu.PrefetchScalarGridSpec(
            num_scalar_prefetch=0,
            grid=grid,
            in_specs=[pl.BlockSpec((tile_rows, W), lambda i: (i, 0))],
            out_specs=pl.BlockSpec((tile_rows, W), lambda i: (i, 0)),
        ),
        compiler_params=pltpu.CompilerParams(
            dimension_semantics=("parallel",),
        ),
        cost_estimate=pl.CostEstimate(
            flops=3 * n,
            transcendentals=0,
            bytes_accessed=2 * total_pad * itemsize,
        ),
    )(x2d)

    out_flat = out2d.reshape(-1)
    if total_pad != n:
        out_flat = out_flat[:n]
    return out_flat.reshape(orig_shape)


def _reference(x, scale=3):
    y = x * scale
    return jnp.clip(y / 6.0 + 0.5, 0.0, 1.0)


if __name__ == "__main__":
    key = jax.random.PRNGKey(0)

    # Main case: NCHW input, valid input range roughly (-1, +1) per module docstring.
    x = jax.random.uniform(key, (2, 4, 16, 16), dtype=jnp.float32,
                           minval=-1.0, maxval=1.0)
    out = scale_hardsigmoid(x, scale=3)
    out = jax.block_until_ready(out)
    ref = _reference(x, scale=3)
    assert out.shape == x.shape and out.dtype == x.dtype
    assert jnp.allclose(out, ref, atol=1e-6), "mismatch vs reference (main)"

    # Odd-sized case to exercise the padded path.
    x2 = jax.random.uniform(jax.random.PRNGKey(1), (3, 5, 7, 11),
                            dtype=jnp.float32, minval=-1.0, maxval=1.0)
    out2 = jax.block_until_ready(scale_hardsigmoid(x2, scale=3))
    assert out2.shape == x2.shape
    assert jnp.allclose(out2, _reference(x2, scale=3), atol=1e-6), \
        "mismatch vs reference (padded)"

    print("KERNEL_OK")
</pallas_src>

<mosaic_0001>
module attributes {stable_mosaic.version = 11 : i64} {
  func.func @_scale_hardsigmoid_kernel(%arg0: i32, %arg1: memref<1x2048xf32, #tpu.memory_space<vmem>>, %arg2: memref<1x2048xf32, #tpu.memory_space<vmem>>) attributes {dimension_semantics = [#tpu.dimension_semantics<parallel>], iteration_bounds = array<i64: 1>, scalar_prefetch = 0 : i64, scratch_operands = 0 : i64, tpu.core_type = #tpu.core_type<tc>, window_params = [{transform_indices = @transform_0, window_bounds = array<i64: 1, 2048>}, {transform_indices = @transform_1, window_bounds = array<i64: 1, 2048>}]} {
    %c0 = arith.constant 0 : index
    %c0_0 = arith.constant 0 : index
    %0 = vector.load %arg1[%c0, %c0_0] : memref<1x2048xf32, #tpu.memory_space<vmem>>, vector<1x2048xf32>
    %cst = arith.constant 5.000000e-01 : f32
    %1 = vector.broadcast %cst : f32 to vector<1x2048xf32>
    %2 = arith.mulf %0, %1 : vector<1x2048xf32>
    %cst_1 = arith.constant 5.000000e-01 : f32
    %3 = vector.broadcast %cst_1 : f32 to vector<1x2048xf32>
    %4 = arith.addf %2, %3 : vector<1x2048xf32>
    %cst_2 = arith.constant 0.000000e+00 : f32
    %cst_3 = arith.constant 1.000000e+00 : f32
    %5 = vector.broadcast %cst_2 : f32 to vector<1x2048xf32>
    %6 = arith.maximumf %5, %4 : vector<1x2048xf32>
    %7 = vector.broadcast %cst_3 : f32 to vector<1x2048xf32>
    %8 = arith.minimumf %7, %6 : vector<1x2048xf32>
    %c0_4 = arith.constant 0 : index
    %c0_5 = arith.constant 0 : index
    %9 = vector.load %arg2[%c0_4, %c0_5] : memref<1x2048xf32, #tpu.memory_space<vmem>>, vector<1x2048xf32>
    tpu.vector_store %arg2[%c0_4, %c0_5], %8 {strides = array<i32>} : memref<1x2048xf32, #tpu.memory_space<vmem>>, vector<1x2048xf32>,
    return
  }
  func.func @transform_0(%arg0: i32) -> (i32, i32) {
    %c0_i32 = arith.constant 0 : i32
    %c0_i32_0 = arith.constant 0 : i32
    return %arg0, %c0_i32 : i32, i32
  }
  func.func @transform_1(%arg0: i32) -> (i32, i32) {
    %c0_i32 = arith.constant 0 : i32
    %c0_i32_0 = arith.constant 0 : i32
    return %arg0, %c0_i32 : i32, i32
  }
}

</mosaic_0001>

<bundles_post_ra>
// kernel: tpu_custom_call.1
= control target key start
LH: loop header
LB: loop body
LE: loop exit
PB: predicated region body
PF: predicated region fallthrough
CT: control target
= control target key end

     0   :  { %6 = vsyncpa [#allocation3], 0  ;;  %s134_s0 = inlined_call_operand.hbm [shape: f32[1,2048], index: 0, kind: input, shape index: {}]   ;;  %s135_s1 = inlined_call_operand.hbm [shape: f32[1,2048], index: 1, kind: output, shape index: {}]  }
   0x1   :  { %7 = vsyncpa [#allocation4], 0  ;;  %s98_s6 = smov [#allocation2]   ;;  %s50_s10 = scalar_lea.hbm %s134_s0, 256 }
   0x2   :  { %s14_s7 = sshll.u32 %s98_s6, 4  ;;  %p51_p0 = scmp.ne.s32.totalorder %s134_s0, %s50_s10  ;;  %s15_s7 = int_to_ptr.vmem [resolvable:$true] %s14_s7 }
   0x3   :  { %p54_p1 = scmp.lt.u32.totalorder %s50_s10, %s134_s0 }
   0x5   :  { %p56_p2 = pnand %p54_p1, %p51_p0 }
   0x7   :  { %59 = shalt.err (!%p56_p2)
}
   0x8   :  { %s60_s15 = scalar_lea.vmem %s15_s7, 256  ;;  %p65_p4 = scmp.lt.s32.totalorder %s15_s7, %s15_s7 }
   0x9   :  { %p61_p3 = scmp.ne.s32.totalorder %s15_s7, %s60_s15  ;;  %p66_p5 = scmp.lt.s32.totalorder %s60_s15, %s60_s15 }
   0xb   :  { %p67_p6 = por %p66_p5, %p65_p4 }
   0xd   :  { %p68_p7 = pnand %p67_p6, %p61_p3 }
   0xf   :  { %71 = shalt.err (!%p68_p7)
}
  0x10   :  { %17 = dma.hbm_to_vmem [thread:$0]  %s134_s0, 256, %s15_s7, [#allocation3]  }
  0x11   :  { %94 = dma.done.wait [#allocation3], 256  }
  0x12   :  { %95 = vsyncadd [#allocation3], 4294967040  ;;  %v21_v0 = vld [vmem:[#allocation2] sm:$0xff]  ;;  %v22_v1 = vld [vmem:[#allocation2 + $0x8] sm:$0xff]  ;;  %s99_s18 = smov [#allocation5]  }
  0x13   :  { %v23_v2 = vmul.f32 0.5, %v21_v0  ;;  %v24_v3 = vmul.f32 0.5, %v22_v1  ;;  %s39_s19 = sshll.u32 %s99_s18, 4  ;;  %s40_s19 = int_to_ptr.vmem [resolvable:$true] %s39_s19 }
  0x14   :  { %s72_s20 = scalar_lea.vmem %s40_s19, 256  ;;  %p77_p9 = scmp.lt.s32.totalorder %s40_s19, %s40_s19 }
  0x15   :  { %v25_v4 = vadd.f32 0.5, %v23_v2  ;;  %v26_v5 = vadd.f32 0.5, %v24_v3  ;;  %p73_p8 = scmp.ne.s32.totalorder %s40_s19, %s72_s20  ;;  %p78_p10 = scmp.lt.s32.totalorder %s72_s20, %s72_s20 }
  0x17   :  { %v27_v6 = vmax.f32 %v25_v4, 0.0  ;;  %v28_v7 = vmax.f32 %v26_v5, 0.0  ;;  %p79_p11 = por %p78_p10, %p77_p9 }
  0x19   :  { %v29_v8 = vmin.f32 %v27_v6, 1.0  ;;  %v30_v9 = vmin.f32 %v28_v7, 1.0  ;;  %p80_p12 = pnand %p79_p11, %p73_p8 }
  0x1b   :  { %31 = vst [vmem:[#allocation5] sm:$0xff] %v29_v8  ;;  %32 = vst [vmem:[#allocation5 + $0x8] sm:$0xff] %v30_v9 }
  0x1c   :  { %83 = shalt.err (!%p80_p12)
}
  0x1d   :  { %s84_s22 = scalar_lea.hbm %s135_s1, 256 }
  0x1e   :  { %p85_p13 = scmp.ne.s32.totalorder %s135_s1, %s84_s22  ;;  %p88_p0 = scmp.lt.u32.totalorder %s84_s22, %s135_s1 }
  0x20   :  { %p90_p1 = pnand %p88_p0, %p85_p13 }
  0x22   :  { %93 = shalt.err (!%p90_p1)
}
  0x23   :  { %42 = dma.vmem_to_hbm [thread:$0]  %s40_s19, 256, %s135_s1, [#allocation4]  }
  0x24   :  { %96 = dma.done.wait [#allocation4], 256  }
  0x25   :  { %97 = vsyncadd [#allocation4], 4294967040 }
  0x26   :  { %46 = vsyncpa [#allocation3], 1 }
  0x27   :  { %47 = vsyncpa [#allocation4], 1 }

</bundles_post_ra>
